<compile_context>
chip_gen: v5e
topology: v5e:2x2
jax: 0.10.0
libtpu: 0.0.40
codegen_flags: <defaults>
</compile_context>

<pallas_src>
import functools

import jax
import jax.numpy as jnp
from jax.experimental import pallas as pl
from jax.experimental.pallas import tpu as pltpu

_LANE = 128  # pad latent / feature dims to this many lanes


def _round_up(x, m):
    return (x + m - 1) // m * m


def _pick_b_tile(batch, t_enc, t_out):
    """Smallest divisor of batch giving >=256 merged matmul rows per grid step
    (feeds the MXU; also yields >=2 'parallel' steps for v7x's two TensorCores
    once batch is large) while keeping every block 8-sublane aligned.  Falls
    back to the whole batch in one step (blocks then equal the full array)."""
    for d in range(1, batch + 1):
        if batch % d:
            continue
        if d * t_enc >= 256 and (d * t_enc) % 8 == 0 and (d * t_out) % 8 == 0:
            return d
    return batch


# ------------------------------ fused kernel -------------------------------

def _cpc_body(x_ref, w_enc_ref, b_enc_ref, w_ar_ref, b_ar_ref, w_dec_ref,
              b_dec_ref, *, b_tile, t_enc, t_out):
    """Shared encoder -> conv1d(k=3,'same') -> decoder body.

    All batches of the current tile are merged into the matmul M dimension:
      x_ref : (b_tile*t_enc, feat) f32 (bf16 cast happens here, in-kernel)
      w_enc : (feat, Lp) bf16   b_enc : (1, Lp) f32
      w_ar  : (3, Lp, Lp) bf16  (tap k, C_in, C_out)   b_ar : (1, Lp) f32
      w_dec : (Lp, Fp) bf16     b_dec : (1, Fp) f32
    Returns dec : (b_tile*t_out, Fp) f32.
    """
    Lp = w_enc_ref.shape[1]
    m_enc = b_tile * t_enc

    # --- encoder: Linear + ReLU (bf16 MXU inputs, f32 accumulate/epilogue) ---
    x = x_ref[...].astype(jnp.bfloat16)
    enc = jnp.dot(x, w_enc_ref[...], preferred_element_type=jnp.float32)
    enc = jnp.maximum(enc + b_enc_ref[...], 0.0)
    encb = enc.astype(jnp.bfloat16)              # cast ONCE right after ReLU

    # --- autoregressive: Conv1d(k=3,'same') as 3 accumulating MXU dots on
    # +-1 row-shifted copies of encb.  Masking the shifts at per-batch window
    # edges gives the 'same' zero padding and stops batch-boundary bleed.
    zrow = jnp.zeros((1, Lp), jnp.bfloat16)
    shift_dn = jnp.concatenate([zrow, encb[:m_enc - 1]], axis=0)   # encb[r-1]
    shift_up = jnp.concatenate([encb[1:], zrow], axis=0)           # encb[r+1]
    local = jax.lax.broadcasted_iota(jnp.int32, (m_enc, 1), 0) % t_enc
    left = jnp.where(local == 0, zrow, shift_dn)
    right = jnp.where(local == t_enc - 1, zrow, shift_up)
    pred = (jnp.dot(left, w_ar_ref[0], preferred_element_type=jnp.float32)
            + jnp.dot(encb, w_ar_ref[1], preferred_element_type=jnp.float32)
            + jnp.dot(right, w_ar_ref[2], preferred_element_type=jnp.float32)
            + b_ar_ref[...])                     # (m_enc, Lp) f32

    # --- keep only the last t_out conv rows of each batch, then decode ---
    if t_enc == t_out:
        sel = pred
    else:
        off = t_enc - t_out
        sel = jnp.concatenate(
            [pred[b * t_enc + off:(b + 1) * t_enc] for b in range(b_tile)],
            axis=0)                              # (b_tile*t_out, Lp)
    dec = jnp.dot(sel.astype(jnp.bfloat16), w_dec_ref[...],
                  preferred_element_type=jnp.float32)
    return dec + b_dec_ref[...]                  # (b_tile*t_out, Fp) f32


def _cpc_eval_kernel(x_ref, w_enc_ref, b_enc_ref, w_ar_ref, b_ar_ref,
                     w_dec_ref, b_dec_ref, o_ref, *, b_tile, t_enc, t_out):
    o_ref[...] = _cpc_body(x_ref, w_enc_ref, b_enc_ref, w_ar_ref, b_ar_ref,
                           w_dec_ref, b_dec_ref,
                           b_tile=b_tile, t_enc=t_enc, t_out=t_out)


def _cpc_train_kernel(x_ref, tgt_ref, w_enc_ref, b_enc_ref, w_ar_ref,
                      b_ar_ref, w_dec_ref, b_dec_ref, loss_ref, *,
                      b_tile, t_enc, t_out, feat):
    dec = _cpc_body(x_ref, w_enc_ref, b_enc_ref, w_ar_ref, b_ar_ref,
                    w_dec_ref, b_dec_ref,
                    b_tile=b_tile, t_enc=t_enc, t_out=t_out)
    diff = dec[:, :feat] - tgt_ref[...]
    loss_ref[0, 0] = jnp.sum(diff * diff)   # per-grid-step partial sum (SMEM)


# --------------------------- weight preparation -----------------------------

def prepare_params(params):
    """One-time weight prep: pad latent/feat to 128 lanes, fold the conv tap
    layout, cast matmul weights to bf16.  Hoisted out of the jitted forward so
    these ~7 tiny XLA ops do not launch on every call.  Padded rows/cols are
    zero, so results are unchanged."""
    feat, latent = params['w_enc'].shape
    Lp = _round_up(latent, _LANE)
    Fp = _round_up(feat, _LANE)
    w_enc = jnp.pad(params['w_enc'],
                    ((0, 0), (0, Lp - latent))).astype(jnp.bfloat16)
    b_enc = jnp.pad(params['b_enc'].reshape(1, latent),
                    ((0, 0), (0, Lp - latent))).astype(jnp.float32)
    # conv taps: (K, C_out, C_in) -> (K, C_in, C_out), padded to (K, Lp, Lp)
    w_ar = jnp.transpose(params['w_ar'], (0, 2, 1))
    w_ar = jnp.pad(w_ar, ((0, 0), (0, Lp - latent),
                          (0, Lp - latent))).astype(jnp.bfloat16)
    b_ar = jnp.pad(params['b_ar'].reshape(1, latent),
                   ((0, 0), (0, Lp - latent))).astype(jnp.float32)
    w_dec = jnp.pad(params['w_dec'],
                    ((0, Lp - latent), (0, Fp - feat))).astype(jnp.bfloat16)
    b_dec = jnp.pad(params['b_dec'].reshape(1, feat),
                    ((0, 0), (0, Fp - feat))).astype(jnp.float32)
    return dict(w_enc=w_enc, b_enc=b_enc, w_ar=w_ar, b_ar=b_ar,
                w_dec=w_dec, b_dec=b_dec)


# --------------------------- SimpleCPC forward -----------------------------

@functools.partial(jax.jit, static_argnums=(2, 3, 4))
def simple_cpc_forward(X, prepped, timesteps_in, timesteps_out, training=False):
    batch, n_windows, channels, length = X.shape
    assert n_windows >= timesteps_in + timesteps_out
    # pred[-timesteps_out:] only has PyTorch-consistent semantics when
    # timesteps_out <= timesteps_in.
    assert timesteps_out <= timesteps_in
    feat = channels * length
    w_enc, b_enc = prepped['w_enc'], prepped['b_enc']
    w_ar, b_ar = prepped['w_ar'], prepped['b_ar']
    w_dec, b_dec = prepped['w_dec'], prepped['b_dec']
    Lp, Fp = w_enc.shape[1], w_dec.shape[1]

    # Only the consumed window tail is encoded / DMA'd; the conv's 'same'
    # zero padding is re-created locally inside the kernel.
    t_out = timesteps_out
    t_enc = min(timesteps_in, t_out + 1)
    b_tile = _pick_b_tile(batch, t_enc, t_out)
    steps = batch // b_tile

    # Single tiny slice+collapse; the bf16 cast happens inside the kernel.
    x_in = X[:, timesteps_in - t_enc:timesteps_in].reshape(batch * t_enc, feat)

    x_spec = pl.BlockSpec((b_tile * t_enc, feat), lambda b: (b, 0))
    const2 = lambda b: (0, 0)
    const3 = lambda b: (0, 0, 0)
    # Weights: constant index_map -> VMEM-resident across grid steps.
    w_specs = [pl.BlockSpec((feat, Lp), const2),
               pl.BlockSpec((1, Lp), const2),
               pl.BlockSpec((3, Lp, Lp), const3),
               pl.BlockSpec((1, Lp), const2),
               pl.BlockSpec((Lp, Fp), const2),
               pl.BlockSpec((1, Fp), const2)]
    cparams = pltpu.CompilerParams(dimension_semantics=("parallel",))

    if not training:
        kernel = functools.partial(_cpc_eval_kernel, b_tile=b_tile,
                                   t_enc=t_enc, t_out=t_out)
        dec = pl.pallas_call(
            kernel,
            out_shape=jax.ShapeDtypeStruct((batch * t_out, Fp), jnp.float32),
            grid=(steps,),
            in_specs=[x_spec] + w_specs,
            out_specs=pl.BlockSpec((b_tile * t_out, Fp), lambda b: (b, 0)),
            compiler_params=cparams,
        )(x_in, w_enc, b_enc, w_ar, b_ar, w_dec, b_dec)
        if Fp != feat:              # drop zero lane padding (no-op if feat%128==0)
            dec = dec[:, :feat]
        return dec.reshape(batch, t_out, channels, length)

    # Training: MSE reduction fused into the kernel; only one f32 partial sum
    # per grid step is written (SMEM), the decoded tensor never hits HBM.
    tgt = X[:, n_windows - t_out:].reshape(batch * t_out, feat)
    kernel = functools.partial(_cpc_train_kernel, b_tile=b_tile, t_enc=t_enc,
                               t_out=t_out, feat=feat)
    partial_loss = pl.pallas_call(
        kernel,
        out_shape=jax.ShapeDtypeStruct((steps, 1), jnp.float32),
        grid=(steps,),
        in_specs=[x_spec,
                  pl.BlockSpec((b_tile * t_out, feat), lambda b: (b, 0))]
                 + w_specs,
        out_specs=pl.BlockSpec((1, 1), lambda b: (b, 0),
                               memory_space=pltpu.SMEM),
        compiler_params=cparams,
    )(x_in, tgt, w_enc, b_enc, w_ar, b_ar, w_dec, b_dec)
    return jnp.sum(partial_loss) / (batch * t_out)


# ------------------------------- reference ---------------------------------

def simple_cpc_reference(X, params, timesteps_in, timesteps_out):
    batch, n_windows, channels, length = X.shape
    latent = params['w_enc'].shape[1]
    x_flat = X.reshape(batch * n_windows, channels * length).astype(jnp.float32)
    enc = jnp.maximum(x_flat @ params['w_enc'] + params['b_enc'], 0.0)
    enc = enc.reshape(batch, n_windows, latent).transpose(0, 2, 1)
    ar_in = enc[:, :, :timesteps_in]
    K = params['w_ar'].shape[0]
    pad = (K - 1) // 2
    xpad = jnp.pad(ar_in, ((0, 0), (0, 0), (pad, pad)))
    pred = sum(jnp.einsum('oi,bit->bot', params['w_ar'][k],
                          xpad[:, :, k:k + timesteps_in]) for k in range(K))
    pred = pred + params['b_ar'][None, :, :]
    pred_out = pred[:, :, -timesteps_out:].transpose(0, 2, 1).reshape(
        batch * timesteps_out, latent)
    dec = pred_out @ params['w_dec'] + params['b_dec']
    return dec.reshape(batch, timesteps_out, channels, length)


# --------------------------------- main -------------------------------------

if __name__ == "__main__":
    batch, n_windows, channels, length = 2, 8, 4, 16
    timesteps_in, timesteps_out, latent = 6, 2, 32
    feat = channels * length

    key = jax.random.PRNGKey(0)
    kx, k1, k2, k3, k4, k5, k6 = jax.random.split(key, 7)

    X = jax.random.normal(kx, (batch, n_windows, channels, length), jnp.float32)

    params = {
        'w_enc': 0.05 * jax.random.normal(k1, (feat, latent), jnp.float32),
        'b_enc': 0.05 * jax.random.normal(k2, (1, latent), jnp.float32),
        'w_ar':  0.05 * jax.random.normal(k3, (3, latent, latent), jnp.float32),
        'b_ar':  0.05 * jax.random.normal(k4, (latent, 1), jnp.float32),
        'w_dec': 0.05 * jax.random.normal(k5, (latent, feat), jnp.float32),
        'b_dec': 0.05 * jax.random.normal(k6, (1, feat), jnp.float32),
    }

    prepped = prepare_params(params)        # one-time weight prep (hoisted)

    # eval-mode forward
    out = simple_cpc_forward(X, prepped, timesteps_in, timesteps_out, False)
    out = jax.block_until_ready(out)
    assert out.shape == (batch, timesteps_out, channels, length)

    # f32 pure-JAX reference; tolerance accounts for bf16 MXU inputs
    ref = simple_cpc_reference(X, params, timesteps_in, timesteps_out)
    assert jnp.allclose(out, ref, atol=1e-2, rtol=1e-2), (
        float(jnp.max(jnp.abs(out - ref))))

    # training-mode forward: fused in-kernel MSE loss (single kernel)
    loss = simple_cpc_forward(X, prepped, timesteps_in, timesteps_out, True)
    loss = jax.block_until_ready(loss)
    ref_loss = jnp.sum(jnp.square(ref - X[:, -timesteps_out:])) / (
        batch * timesteps_out)
    assert jnp.allclose(loss, ref_loss, atol=1e-2, rtol=2e-2), (
        float(loss), float(ref_loss))

    print("KERNEL_OK")
</pallas_src>

<mosaic_0001>
module attributes {stable_mosaic.version = 11 : i64} {
  func.func @_cpc_eval_kernel(%arg0: i32, %arg1: memref<6x64xf32, #tpu.memory_space<vmem>>, %arg2: memref<64x128xbf16, #tpu.memory_space<vmem>>, %arg3: memref<1x128xf32, #tpu.memory_space<vmem>>, %arg4: memref<3x128x128xbf16, #tpu.memory_space<vmem>>, %arg5: memref<1x128xf32, #tpu.memory_space<vmem>>, %arg6: memref<128x128xbf16, #tpu.memory_space<vmem>>, %arg7: memref<1x128xf32, #tpu.memory_space<vmem>>, %arg8: memref<4x128xf32, #tpu.memory_space<vmem>>) attributes {dimension_semantics = [#tpu.dimension_semantics<parallel>], iteration_bounds = array<i64: 1>, scalar_prefetch = 0 : i64, scratch_operands = 0 : i64, tpu.core_type = #tpu.core_type<tc>, window_params = [{transform_indices = @transform_0, window_bounds = array<i64: 6, 64>}, {pipeline_mode = #tpu.pipeline_mode<synchronous>, transform_indices = @transform_1, window_bounds = array<i64: 64, 128>}, {pipeline_mode = #tpu.pipeline_mode<synchronous>, transform_indices = @transform_2, window_bounds = array<i64: 1, 128>}, {pipeline_mode = #tpu.pipeline_mode<synchronous>, transform_indices = @transform_3, window_bounds = array<i64: 3, 128, 128>}, {pipeline_mode = #tpu.pipeline_mode<synchronous>, transform_indices = @transform_4, window_bounds = array<i64: 1, 128>}, {pipeline_mode = #tpu.pipeline_mode<synchronous>, transform_indices = @transform_5, window_bounds = array<i64: 128, 128>}, {pipeline_mode = #tpu.pipeline_mode<synchronous>, transform_indices = @transform_6, window_bounds = array<i64: 1, 128>}, {transform_indices = @transform_7, window_bounds = array<i64: 4, 128>}]} {
    %c0 = arith.constant 0 : index
    %c0_0 = arith.constant 0 : index
    %0 = vector.load %arg1[%c0, %c0_0] : memref<6x64xf32, #tpu.memory_space<vmem>>, vector<6x64xf32>
    %1 = arith.truncf %0 : vector<6x64xf32> to vector<6x64xbf16>
    %c0_1 = arith.constant 0 : index
    %c0_2 = arith.constant 0 : index
    %2 = vector.load %arg2[%c0_1, %c0_2] : memref<64x128xbf16, #tpu.memory_space<vmem>>, vector<64x128xbf16>
    %cst = arith.constant dense<0.000000e+00> : vector<6x128xf32>
    %3 = tpu.matmul %1, %2, %cst {dimension_numbers = #tpu.dot_dimension_numbers<[1], [0], [0], [1], [0, 0, 1, 1], [], []>} : vector<6x64xbf16>, vector<64x128xbf16>, vector<6x128xf32> -> vector<6x128xf32>
    %c0_3 = arith.constant 0 : index
    %c0_4 = arith.constant 0 : index
    %4 = vector.load %arg3[%c0_3, %c0_4] : memref<1x128xf32, #tpu.memory_space<vmem>>, vector<1x128xf32>
    %5 = vector.broadcast %4 : vector<1x128xf32> to vector<6x128xf32>
    %6 = arith.addf %3, %5 : vector<6x128xf32>
    %cst_5 = arith.constant 0.000000e+00 : f32
    %7 = vector.broadcast %cst_5 : f32 to vector<6x128xf32>
    %8 = arith.maximumf %6, %7 : vector<6x128xf32>
    %9 = arith.truncf %8 : vector<6x128xf32> to vector<6x128xbf16>
    %cst_6 = arith.constant 0.000000e+00 : bf16
    %10 = vector.broadcast %cst_6 : bf16 to vector<1x128xbf16>
    %11 = vector.extract_strided_slice %9 {offsets = [0, 0], sizes = [5, 128], strides = [1, 1]} : vector<6x128xbf16> to vector<5x128xbf16>
    %12 = tpu.concatenate %10, %11 in 0 : vector<1x128xbf16>, vector<5x128xbf16> -> vector<6x128xbf16>
    %13 = vector.extract_strided_slice %9 {offsets = [1, 0], sizes = [5, 128], strides = [1, 1]} : vector<6x128xbf16> to vector<5x128xbf16>
    %14 = tpu.concatenate %13, %10 in 0 : vector<5x128xbf16>, vector<1x128xbf16> -> vector<6x128xbf16>
    %15 = tpu.iota {dimensions = array<i32: 0>} : vector<6x1xi32>
    %c3_i32 = arith.constant 3 : i32
    %c0_i32 = arith.constant 0 : i32
    %16 = arith.cmpi eq, %c3_i32, %c0_i32 : i32
    %c1_i32 = arith.constant 1 : i32
    %17 = arith.select %16, %c1_i32, %c3_i32 : i32
    %18 = vector.broadcast %17 : i32 to vector<6x1xi32>
    %19 = arith.remsi %15, %18 : vector<6x1xi32>
    %c0_i32_7 = arith.constant 0 : i32
    %20 = vector.broadcast %c0_i32_7 : i32 to vector<6x1xi32>
    %21 = arith.cmpi ne, %19, %20 : vector<6x1xi32>
    %c0_i32_8 = arith.constant 0 : i32
    %22 = vector.broadcast %c0_i32_8 : i32 to vector<6x1xi32>
    %23 = arith.cmpi slt, %19, %22 : vector<6x1xi32>
    %c0_i32_9 = arith.constant 0 : i32
    %24 = arith.cmpi slt, %17, %c0_i32_9 : i32
    %25 = vector.broadcast %24 : i1 to vector<6x1xi1>
    %26 = vector.broadcast %25 : vector<6x1xi1> to vector<6x1xi1>
    %27 = arith.xori %23, %26 : vector<6x1xi1>
    %28 = arith.andi %27, %21 : vector<6x1xi1>
    %29 = vector.broadcast %17 : i32 to vector<6x1xi32>
    %30 = arith.addi %19, %29 : vector<6x1xi32>
    %31 = arith.select %28, %30, %19 : vector<6x1xi1>, vector<6x1xi32>
    %c0_i32_10 = arith.constant 0 : i32
    %32 = vector.broadcast %c0_i32_10 : i32 to vector<6x1xi32>
    %33 = arith.cmpi eq, %31, %32 : vector<6x1xi32>
    %34 = vector.shape_cast %33 : vector<6x1xi1> to vector<6x1xi1>
    %35 = vector.broadcast %34 : vector<6x1xi1> to vector<6x128xi1>
    %36 = vector.shape_cast %10 : vector<1x128xbf16> to vector<1x128xbf16>
    %37 = vector.broadcast %36 : vector<1x128xbf16> to vector<6x128xbf16>
    %38 = arith.select %35, %37, %12 : vector<6x128xi1>, vector<6x128xbf16>
    %c2_i32 = arith.constant 2 : i32
    %39 = vector.broadcast %c2_i32 : i32 to vector<6x1xi32>
    %40 = arith.cmpi eq, %31, %39 : vector<6x1xi32>
    %41 = vector.shape_cast %40 : vector<6x1xi1> to vector<6x1xi1>
    %42 = vector.broadcast %41 : vector<6x1xi1> to vector<6x128xi1>
    %43 = vector.shape_cast %10 : vector<1x128xbf16> to vector<1x128xbf16>
    %44 = vector.broadcast %43 : vector<1x128xbf16> to vector<6x128xbf16>
    %45 = arith.select %42, %44, %14 : vector<6x128xi1>, vector<6x128xbf16>
    %c0_11 = arith.constant 0 : index
    %c0_12 = arith.constant 0 : index
    %c0_13 = arith.constant 0 : index
    %46 = vector.load %arg4[%c0_11, %c0_12, %c0_13] : memref<3x128x128xbf16, #tpu.memory_space<vmem>>, vector<1x128x128xbf16>
    %47 = vector.shape_cast %46 : vector<1x128x128xbf16> to vector<128x128xbf16>
    %cst_14 = arith.constant dense<0.000000e+00> : vector<6x128xf32>
    %48 = tpu.matmul %38, %47, %cst_14 {dimension_numbers = #tpu.dot_dimension_numbers<[1], [0], [0], [1], [0, 0, 1, 1], [], []>} : vector<6x128xbf16>, vector<128x128xbf16>, vector<6x128xf32> -> vector<6x128xf32>
    %c1 = arith.constant 1 : index
    %c0_15 = arith.constant 0 : index
    %c0_16 = arith.constant 0 : index
    %49 = vector.load %arg4[%c1, %c0_15, %c0_16] : memref<3x128x128xbf16, #tpu.memory_space<vmem>>, vector<1x128x128xbf16>
    %50 = vector.shape_cast %49 : vector<1x128x128xbf16> to vector<128x128xbf16>
    %cst_17 = arith.constant dense<0.000000e+00> : vector<6x128xf32>
    %51 = tpu.matmul %9, %50, %cst_17 {dimension_numbers = #tpu.dot_dimension_numbers<[1], [0], [0], [1], [0, 0, 1, 1], [], []>} : vector<6x128xbf16>, vector<128x128xbf16>, vector<6x128xf32> -> vector<6x128xf32>
    %52 = arith.addf %48, %51 : vector<6x128xf32>
    %c2 = arith.constant 2 : index
    %c0_18 = arith.constant 0 : index
    %c0_19 = arith.constant 0 : index
    %53 = vector.load %arg4[%c2, %c0_18, %c0_19] : memref<3x128x128xbf16, #tpu.memory_space<vmem>>, vector<1x128x128xbf16>
    %54 = vector.shape_cast %53 : vector<1x128x128xbf16> to vector<128x128xbf16>
    %cst_20 = arith.constant dense<0.000000e+00> : vector<6x128xf32>
    %55 = tpu.matmul %45, %54, %cst_20 {dimension_numbers = #tpu.dot_dimension_numbers<[1], [0], [0], [1], [0, 0, 1, 1], [], []>} : vector<6x128xbf16>, vector<128x128xbf16>, vector<6x128xf32> -> vector<6x128xf32>
    %56 = arith.addf %52, %55 : vector<6x128xf32>
    %c0_21 = arith.constant 0 : index
    %c0_22 = arith.constant 0 : index
    %57 = vector.load %arg5[%c0_21, %c0_22] : memref<1x128xf32, #tpu.memory_space<vmem>>, vector<1x128xf32>
    %58 = vector.broadcast %57 : vector<1x128xf32> to vector<6x128xf32>
    %59 = arith.addf %56, %58 : vector<6x128xf32>
    %60 = vector.extract_strided_slice %59 {offsets = [1, 0], sizes = [2, 128], strides = [1, 1]} : vector<6x128xf32> to vector<2x128xf32>
    %61 = vector.extract_strided_slice %59 {offsets = [4, 0], sizes = [2, 128], strides = [1, 1]} : vector<6x128xf32> to vector<2x128xf32>
    %62 = tpu.concatenate %60, %61 in 0 : vector<2x128xf32>, vector<2x128xf32> -> vector<4x128xf32>
    %63 = arith.truncf %62 : vector<4x128xf32> to vector<4x128xbf16>
    %c0_23 = arith.constant 0 : index
    %c0_24 = arith.constant 0 : index
    %64 = vector.load %arg6[%c0_23, %c0_24] : memref<128x128xbf16, #tpu.memory_space<vmem>>, vector<128x128xbf16>
    %cst_25 = arith.constant dense<0.000000e+00> : vector<4x128xf32>
    %65 = tpu.matmul %63, %64, %cst_25 {dimension_numbers = #tpu.dot_dimension_numbers<[1], [0], [0], [1], [0, 0, 1, 1], [], []>} : vector<4x128xbf16>, vector<128x128xbf16>, vector<4x128xf32> -> vector<4x128xf32>
    %c0_26 = arith.constant 0 : index
    %c0_27 = arith.constant 0 : index
    %66 = vector.load %arg7[%c0_26, %c0_27] : memref<1x128xf32, #tpu.memory_space<vmem>>, vector<1x128xf32>
    %67 = vector.broadcast %66 : vector<1x128xf32> to vector<4x128xf32>
    %68 = arith.addf %65, %67 : vector<4x128xf32>
    %c0_28 = arith.constant 0 : index
    %c0_29 = arith.constant 0 : index
    %69 = vector.load %arg8[%c0_28, %c0_29] : memref<4x128xf32, #tpu.memory_space<vmem>>, vector<4x128xf32>
    tpu.vector_store %arg8[%c0_28, %c0_29], %68 {strides = array<i32>} : memref<4x128xf32, #tpu.memory_space<vmem>>, vector<4x128xf32>,
    return
  }
  func.func @transform_0(%arg0: i32) -> (i32, i32) {
    %c0_i32 = arith.constant 0 : i32
    %c0_i32_0 = arith.constant 0 : i32
    return %arg0, %c0_i32 : i32, i32
  }
  func.func @transform_1(%arg0: i32) -> (i32, i32) {
    %c0_i32 = arith.constant 0 : i32
    %c0_i32_0 = arith.constant 0 : i32
    %c0_i32_1 = arith.constant 0 : i32
    return %c0_i32, %c0_i32_0 : i32, i32
  }
  func.func @transform_2(%arg0: i32) -> (i32, i32) {
    %c0_i32 = arith.constant 0 : i32
    %c0_i32_0 = arith.constant 0 : i32
    %c0_i32_1 = arith.constant 0 : i32
    return %c0_i32, %c0_i32_0 : i32, i32
  }
  func.func @transform_3(%arg0: i32) -> (i32, i32, i32) {
    %c0_i32 = arith.constant 0 : i32
    %c0_i32_0 = arith.constant 0 : i32
    %c0_i32_1 = arith.constant 0 : i32
    %c0_i32_2 = arith.constant 0 : i32
    return %c0_i32, %c0_i32_0, %c0_i32_1 : i32, i32, i32
  }
  func.func @transform_4(%arg0: i32) -> (i32, i32) {
    %c0_i32 = arith.constant 0 : i32
    %c0_i32_0 = arith.constant 0 : i32
    %c0_i32_1 = arith.constant 0 : i32
    return %c0_i32, %c0_i32_0 : i32, i32
  }
  func.func @transform_5(%arg0: i32) -> (i32, i32) {
    %c0_i32 = arith.constant 0 : i32
    %c0_i32_0 = arith.constant 0 : i32
    %c0_i32_1 = arith.constant 0 : i32
    return %c0_i32, %c0_i32_0 : i32, i32
  }
  func.func @transform_6(%arg0: i32) -> (i32, i32) {
    %c0_i32 = arith.constant 0 : i32
    %c0_i32_0 = arith.constant 0 : i32
    %c0_i32_1 = arith.constant 0 : i32
    return %c0_i32, %c0_i32_0 : i32, i32
  }
  func.func @transform_7(%arg0: i32) -> (i32, i32) {
    %c0_i32 = arith.constant 0 : i32
    %c0_i32_0 = arith.constant 0 : i32
    return %arg0, %c0_i32 : i32, i32
  }
}

</mosaic_0001>

<bundles_post_ra>
// kernel: simple_cpc_forward.1
= control target key start
LH: loop header
LB: loop body
LE: loop exit
PB: predicated region body
PF: predicated region fallthrough
CT: control target
= control target key end

     0   :  { %12 = vsyncpa [#allocation3], 0  ;;  %s838_s0 = inlined_call_operand.vmem [shape: f32[6,64], index: 0, kind: input, shape index: {}]   ;;  %s839_s1 = inlined_call_operand.vmem [shape: bf16[64,128], index: 1, kind: input, shape index: {}]   ;;  %s840_s2 = inlined_call_operand.vmem [shape: f32[1,128], index: 2, kind: input, shape index: {}]   ;;  %s841_s3 = inlined_call_operand.hbm [shape: bf16[3,128,128], index: 3, kind: input, shape index: {}]   ;;  %s842_s4 = inlined_call_operand.vmem [shape: f32[1,128], index: 4, kind: input, shape index: {}]   ;;  %s843_s5 = inlined_call_operand.hbm [shape: bf16[128,128], index: 5, kind: input, shape index: {}]   ;;  %s844_s6 = inlined_call_operand.vmem [shape: f32[1,128], index: 6, kind: input, shape index: {}]   ;;  %s845_s7 = inlined_call_operand.vmem [shape: f32[4,128], index: 7, kind: output, shape index: {}]  }
   0x1   :  { %s24_s26 = sshll.u32 %s841_s3, 4  ;;  %s25_s26 = int_to_ptr.hbm [resolvable:$true] %s24_s26 }
   0x2   :  { %13 = vsyncpa [#allocation5], 0  ;;  %s760_s27 = smov [#allocation2]   ;;  %s39_s8 = sshll.u32 %s843_s5, 4  ;;  %s40_s8 = int_to_ptr.hbm [resolvable:$true] %s39_s8 }
   0x3   :  { %s26_s28 = sshll.u32 %s760_s27, 4  ;;  %s761_s9 = smov 64   ;;  %s27_s28 = int_to_ptr.vmem [resolvable:$true] %s26_s28 }
   0x4   :  { %s762_s10 = smov 4   ;;  %s763_s11 = smov [#allocation4]  }
   0x5   :  { %32 = dma.hbm_to_vmem [thread:$0]  %s25_s26, 3072, %s27_s28, [#allocation3], %s761_s9, %s761_s9, %s762_s10  }
   0x6   :  { %s41_s12 = sshll.u32 %s763_s11, 4  ;;  %s42_s12 = int_to_ptr.vmem [resolvable:$true] %s41_s12 }
   0x7   :  { %47 = dma.hbm_to_vmem [thread:$0]  %s40_s8, 1024, %s42_s12, [#allocation5], %s761_s9, %s761_s9, %s762_s10  }
   0x8   :  { %756 = dma.done.wait [#allocation3], 3072  }
   0x9   :  { %757 = vsyncadd [#allocation3], 4294964224 }
   0xa   :  { %758 = dma.done.wait [#allocation5], 1024  }
   0xb   :  { %759 = vsyncadd [#allocation5], 4294966272  ;;  %v667_v0 = vld [vmem:[%s839_s1 + $0x18] sm:$0xff]  ;;  %v666_v2 = vld [vmem:[%s839_s1 + $0x10] sm:$0xff]  ;;  %vm97_vm0 = vcmask 523264   ;;  %v138_v18 = vlaneseq  ;;  %v764_v35 = vmov 0  }
   0xc   :  { %v683_v1 = vld [vmem:[#allocation2 + $0x78] sm:$0xff]  ;;  %105 = vmatpush.bf16.msra.mxu0 %v667_v0  ;;  %v682_v3 = vld [vmem:[#allocation2 + $0x70] sm:$0xff]  ;;  %v665_v8 = vld [vmem:[%s839_s1 + $0x8] sm:$0xff]  ;;  %vm127_vm6 = vcmask 1040384   ;;  %vm128_vm7 = vsmask.f32 256 }
   0xd   :  { %265 = vmatpush.bf16.msra.mxu1 %v683_v1  ;;  %v675_v4 = vld [vmem:[#allocation2 + $0x38] sm:$0xff]  ;;  %v674_v6 = vld [vmem:[#allocation2 + $0x30] sm:$0xff]  ;;  %v681_v9 = vld [vmem:[#allocation2 + $0x68] sm:$0xff]  ;;  %v139_v19 = vshrl.u32 %v138_v18, 7  ;;  %vm134_vm8 = vcmask 1042432  }
   0xe   :  { %v691_v5 = vld [vmem:[#allocation2 + $0xb8] sm:$0xff]  ;;  %326 = vmatpush.bf16.msra.mxu2 %v675_v4  ;;  %v690_v7 = vld [vmem:[#allocation2 + $0xb0] sm:$0xff]  ;;  %v673_v10 = vld [vmem:[#allocation2 + $0x28] sm:$0xff]  ;;  %vm135_vm9 = vsmask.f32 2304 }
   0xf   :  { %404 = vmatpush.bf16.msra.mxu3 %v691_v5  ;;  %v689_v11 = vld [vmem:[#allocation2 + $0xa8] sm:$0xff]  ;;  %v664_v12 = vld [vmem:[%s839_s1] sm:$0xff]  ;;  %v679_v16 = vld [vmem:[#allocation2 + $0x58] sm:$0xff]  ;;  %v143_v20 = vand.u32 65535, %v139_v19  ;;  %v144_v21 = vshrl.u32 %v139_v19, 16 }
  0x10   :  { %106 = vmatpush.bf16.msra.mxu0 %v666_v2  ;;  %v59_v13 = vld [vmem:[%s838_s0] sm:$0x3f]  ;;  %v678_v17 = vld [vmem:[#allocation2 + $0x50] sm:$0xff]  ;;  %v677_v26 = vld [vmem:[#allocation2 + $0x48] sm:$0xff] }
  0x11   :  { %266 = vmatpush.bf16.msra.mxu1 %v682_v3  ;;  %v680_v14 = vld [vmem:[#allocation2 + $0x60] sm:$0xff]  ;;  %v60_v15 = vpack.c.bf16 %v59_v13, %v59_v13  ;;  %v147_v22 = vmul.u32 43690, %v143_v20  ;;  %v146_v23 = vmul.u32 43691, %v143_v20  ;;  %v148_v24 = vmul.u32 43691, %v144_v21  ;;  %v671_v32 = vld [vmem:[#allocation2 + $0x18] sm:$0xff]  ;;  %v670_v37 = vld [vmem:[#allocation2 + $0x10] sm:$0xff] }
  0x12   :  { %327 = vmatpush.bf16.msra.mxu2 %v674_v6  ;;  %v672_v27 = vld [vmem:[#allocation2 + $0x20] sm:$0xff]  ;;  %v687_v33 = vld [vmem:[#allocation2 + $0x98] sm:$0xff]  ;;  %v149_v34 = vmul.u32 43690, %v144_v21  ;;  %v686_v38 = vld [vmem:[#allocation2 + $0x90] sm:$0xff] }
  0x13   :  { %405 = vmatpush.bf16.msra.mxu3 %v690_v7  ;;  %v150_v25 = vshll.u32 %v147_v22, 16  ;;  %v688_v28 = vld [vmem:[#allocation2 + $0xa0] sm:$0xff]  ;;  %v152_v29 = vshll.u32 %v148_v24, 16  ;;  %v669_v41 = vld [vmem:[#allocation2 + $0x8] sm:$0xff]  ;;  %v151_v43 = vshrl.u32 %v147_v22, 16  ;;  %v153_v47 = vshrl.u32 %v148_v24, 16  ;;  %vm129_vm11 = vmand %vm127_vm6, %vm128_vm7 }
  0x14   :  { %107 = vmatpush.bf16.msra.mxu0 %v665_v8  ;;  %v676_v31 = vld [vmem:[#allocation2 + $0x40] sm:$0xff]  ;;  %v685_v42 = vld [vmem:[#allocation2 + $0x88] sm:$0xff]  ;;  %v699_v50 = vld [vmem:[#allocation4 + $0x38] sm:$0xff] }
  0x15   :  { %267 = vmatpush.bf16.msra.mxu1 %v681_v9  ;;  %vm154_vm1 = vc.u32 %v146_v23, %v150_v25  ;;  %v156_v30 = vadd.s32 %v150_v25, %v146_v23  ;;  %v668_v45 = vld [vmem:[#allocation2] sm:$0xff]  ;;  %vm136_vm13 = vmand %vm134_vm8, %vm135_vm9  ;;  %v695_v13 = vld [vmem:[#allocation4 + $0x18] sm:$0xff] }
  0x16   :  { %328 = vmatpush.bf16.msra.mxu2 %v673_v10  ;;  %v155_v36 = vsel %vm154_vm1, 1, %v764_v35  ;;  %v684_v46 = vld [vmem:[#allocation2 + $0x80] sm:$0xff]  ;;  %v698_v10 = vld [vmem:[#allocation4 + $0x30] sm:$0xff] }
  0x17   :  { %406 = vmatpush.bf16.msra.mxu3 %v689_v11  ;;  %vm158_vm2 = vc.u32 %v156_v30, %v152_v29  ;;  %v157_v39 = vadd.s32 %v155_v36, %v149_v34  ;;  %v705_v53 = vld [vmem:[%s840_s2] ss:$0 sm:$0xff]  ;;  %v697_v11 = vld [vmem:[#allocation4 + $0x28] sm:$0xff] }
  0x18   :  { %108 = vmatpush.bf16.msra.mxu0 %v664_v12  ;;  %v159_v40 = vsel %vm158_vm2, 1, %v764_v35  ;;  %v696_v12 = vld [vmem:[#allocation4 + $0x20] sm:$0xff] }
  0x19   :  { %268 = vmatpush.bf16.msra.mxu1 %v680_v14  ;;  %v161_v44 = vadd.s32 %v159_v40, %v157_v39  ;;  %v694_v14 = vld [vmem:[#allocation4 + $0x10] sm:$0xff]  ;;  %v706_v22 = vld [vmem:[%s842_s4] ss:$0 sm:$0xff] }
  0x1a   :  { %329 = vmatpush.bf16.msra.mxu2 %v672_v27 }
  0x1b   :  { %535 = vmatmul.msk.bf16.vlgmr.msra.gmra.mxu0 %vm97_vm0, %v60_v15  ;;  %407 = vmatpush.bf16.msra.mxu3 %v688_v28  ;;  %v162_v48 = vadd.s32 %v161_v44, %v151_v43  ;;  %v693_v15 = vld [vmem:[#allocation4 + $0x8] sm:$0xff]  ;;  %vm428_vm0 = vcmask 1041408  }
  0x1c   :  { %499 = vmatpush.bf16.msrb.mxu0 %v699_v50 }
  0x1d   :  { %269 = vmatpush.bf16.msra.mxu1 %v679_v16  ;;  %v163_v49 = vadd.s32 %v162_v48, %v153_v47  ;;  %v692_v16 = vld [vmem:[#allocation4] sm:$0xff] }
  0x1e   :  { %330 = vmatpush.bf16.msra.mxu2 %v671_v32 }
  0x1f   :  { %408 = vmatpush.bf16.msra.mxu3 %v687_v33  ;;  %v164_v51 = vshrl.u32 %v163_v49, 1 }
  0x20   :  { %500 = vmatpush.bf16.msrb.mxu0 %v698_v10 }
  0x21   :  { %270 = vmatpush.bf16.msra.mxu1 %v678_v17  ;;  %v165_v52 = vmul.u32 3, %v164_v51 }
  0x22   :  { %331 = vmatpush.bf16.msra.mxu2 %v670_v37 }
  0x23   :  { %409 = vmatpush.bf16.msra.mxu3 %v686_v38  ;;  %v166_v54 = vsub.s32 %v139_v19, %v165_v52 }
  0x24   :  { %501 = vmatpush.bf16.msrb.mxu0 %v697_v11 }
  0x25   :  { %271 = vmatpush.bf16.msra.mxu1 %v677_v26  ;;  %vm169_vm3 = vcmp.ne.s32.totalorder %v166_v54, 0  ;;  %vm170_vm4 = vcmp.lt.s32.totalorder %v166_v54, 0  ;;  %v172_v58 = vadd.s32 3, %v166_v54 }
  0x26   :  { %332 = vmatpush.bf16.msra.mxu2 %v669_v41  ;;  %vm171_vm5 = vmand %vm170_vm4, %vm169_vm3 }
  0x27   :  { %410 = vmatpush.bf16.msra.mxu3 %v685_v42  ;;  %v173_v62 = vsel %vm171_vm5, %v172_v58, %v166_v54 }
  0x28   :  { %vm174_vm10 = vcmp.eq.s32.totalorder %v173_v62, 0  ;;  %vm179_vm12 = vcmp.eq.s32.totalorder %v173_v62, 2  ;;  %502 = vmatpush.bf16.msrb.mxu0 %v696_v12 }
  0x29   :  { %272 = vmatpush.bf16.msra.mxu1 %v676_v31  ;;  %vm177_vm14 = vmpackc.low %vm174_vm10, %vm174_vm10  ;;  %v707_v31 = vld [vmem:[%s844_s6] ss:$0 sm:$0xff] }
  0x2a   :  { %333 = vmatpush.bf16.msra.mxu2 %v668_v45  ;;  %vm182_vm15 = vmpackc.low %vm179_vm12, %vm179_vm12 }
  0x2b   :  { %411 = vmatpush.bf16.msra.mxu3 %v684_v46 }
  0x2c   :  { %503 = vmatpush.bf16.msrb.mxu0 %v695_v13 }
  0x30   :  { %504 = vmatpush.bf16.msrb.mxu0 %v694_v14 }
  0x34   :  { %505 = vmatpush.bf16.msrb.mxu0 %v693_v15 }
  0x38   :  { %506 = vmatpush.bf16.msrb.mxu0 %v692_v16 }
  0x98   :  { %v110_v55 = vpop.f32.mrf.mxu0 }
  0x99   :  { %v111_v56 = vadd.f32 %v705_v53, %v110_v55 }
  0x9b   :  { %v114_v57 = vmax.f32 %v111_v56, 0.0 }
  0x9d   :  { %v115_v59 = vpack.c.bf16 %v114_v57, %v114_v57 }
  0x9f   :  { %v117_v60 = vunpack.c.l.b16 %v115_v59  ;;  %273 = vmatmul.bf16.vlgmr.msra.gmra.mxu1 %v115_v59 }
  0xa0   :  { %v112_v61 = vpop.f32.mrf.mxu0 }
  0xa1   :  { %v118_v63 = vpack.c.b16 %v117_v60, %v117_v60 }
  0xa3   :  { %v120_v0 = vshrl.u32 %v118_v63, 16  ;;  %v123_v1 = vshll.u32 %v118_v63, 16 }
  0xa5   :  { %v122_v2 = vrot.slane %v120_v0, 7  ;;  %v131_v3 = vrot.slane %v123_v1, 1 }
  0xa7   :  { %v125_v4 = vor.u32 %v123_v1, %v122_v2  ;;  %v132_v5 = vor.u32 %v131_v3, %v120_v0 }
  0xa9   :  { %v130_v6 = vsel %vm129_vm11, 0, %v125_v4  ;;  %v137_v7 = vsel %vm136_vm13, %v132_v5, 0 }
  0xaa   :  { %v178_v8 = vsel %vm177_vm14, 0, %v130_v6  ;;  %v183_v9 = vsel %vm182_vm15, 0, %v137_v7 }
  0xab   :  { %334 = vmatmul.bf16.vlgmr.msra.gmra.mxu2 %v178_v8  ;;  %412 = vmatmul.bf16.vlgmr.msra.gmra.mxu3 %v183_v9 }
 0x11c   :  { %v274_v17 = vpop.f32.mrf.mxu1 }
 0x124   :  { %v276_v18 = vpop.f32.mrf.mxu1 }
 0x12e   :  { %v335_v19 = vpop.f32.mrf.mxu2  ;;  %v413_v20 = vpop.f32.mrf.mxu3 }
 0x12f   :  { %v336_v21 = vadd.f32 %v335_v19, %v274_v17 }
 0x131   :  { %v417_v23 = vadd.f32 %v413_v20, %v336_v21 }
 0x133   :  { %v422_v24 = vadd.f32 %v706_v22, %v417_v23 }
 0x135   :  { %v424_v25 = vrot.slane %v422_v24, 1  ;;  %v426_v26 = vrot.slane %v422_v24, 2 }
 0x136   :  { %v337_v27 = vpop.f32.mrf.mxu2  ;;  %v415_v28 = vpop.f32.mrf.mxu3 }
 0x137   :  { %v429_v29 = vsel %vm428_vm0, %v424_v25, %v426_v26 }
 0x138   :  { %v430_v30 = vpack.c.bf16 %v429_v29, %v429_v29 }
 0x13a   :  { %507 = vmatmul.bf16.vlgmr.msrb.gmra.mxu0 %v430_v30 }
 0x1b7   :  { %v508_v32 = vpop.f32.mrf.mxu0 }
 0x1b8   :  { %v509_v33 = vadd.f32 %v707_v31, %v508_v32 }
 0x1ba   :  { %512 = vst [vmem:[%s845_s7] sm:$0xf] %v509_v33 }
 0x1bf   :  { %v510_v34 = vpop.f32.mrf.mxu0 }
 0x1c0   :  { %517 = vsyncpa [#allocation3], 1 }
 0x1c1   :  { %518 = vsyncpa [#allocation5], 1 }

</bundles_post_ra>
